<compile_context>
chip_gen: v6e
topology: v6e:2x2x1
jax: 0.10.0
libtpu: 0.0.40
codegen_flags: <defaults>
</compile_context>

<pallas_src>
import jax
import jax.numpy as jnp
from jax.experimental import pallas as pl
from jax.experimental.pallas import tpu as pltpu

LANE = 128
SUB = 8
# Per-tile element cap (th * padded_W): keeps the unrolled channel loop's live
# vector temporaries at a spill level that has been validated to compile/run
# cleanly, while still amortizing the ~0.35 us per-grid-step overhead.
MAX_TILE_ELEMS = 128 * 1024
# Byte budget for the double-buffered input blocks (fits every generation's
# default scoped-VMEM limit with headroom, even at large channel counts).
IN_BUDGET_BYTES = 10 * 1024 * 1024
MIN_TILE_ELEMS = 16 * 1024      # don't shrink below this while chasing grid steps
TARGET_GRID_STEPS = 4           # feed both TensorCores (v7x) / hide pipeline ramp


def _round_up(x, m):
    return ((x + m - 1) // m) * m


def _cdiv(a, b):
    return -(-a // b)


def _make_kernel(num_ch, th, h, w, mask_tail):
    """Fused framefield-align kernel for one (batch, h-tile) grid step."""
    n_h_tiles = _cdiv(h, th)
    last_valid = h - (n_h_tiles - 1) * th      # valid rows in the last H tile

    def fold_rows(a):
        # (th, w) -> (8, w): sublane-aligned static slices + full-vreg VPU adds
        # (no XLU reduce, output store stays a full (8, w) slab).
        p = a[0:SUB, :]
        for s in range(1, th // SUB):
            p = p + a[s * SUB:(s + 1) * SUB, :]
        return p

    def kernel(*refs):
        c_ref = refs[0]                                   # (1, 4, th, w)
        z_refs = refs[1:1 + num_ch]                       # each (1, 1, 2, th, w)
        gn_refs = refs[1 + num_ch:1 + 2 * num_ch]         # each (1, 1, th, w)
        out_ref = refs[1 + 2 * num_ch]                    # (1, 1, 8, w)

        # Crossfield targets are shared by every channel: load/upcast once.
        c0r = c_ref[0, 0].astype(jnp.float32)
        c0i = c_ref[0, 1].astype(jnp.float32)
        c2r = c_ref[0, 2].astype(jnp.float32)
        c2i = c_ref[0, 3].astype(jnp.float32)

        acc = jnp.zeros((th, w), jnp.float32)
        for ch in range(num_ch):            # static unroll over pre_channel
            zr = z_refs[ch][0, 0, 0].astype(jnp.float32)
            zi = z_refs[ch][0, 0, 1].astype(jnp.float32)
            gn = gn_refs[ch][0, 0].astype(jnp.float32)
            # z^2
            z2r = zr * zr - zi * zi
            z2i = 2.0 * zr * zi
            # z^4 = (z^2)^2
            z4r = z2r * z2r - z2i * z2i
            z4i = 2.0 * z2r * z2i
            # c2 * z^2
            c2z2r = c2r * z2r - c2i * z2i
            c2z2i = c2r * z2i + c2i * z2r
            # f(z) = z^4 + c2 z^2 + c0 ; align = |f|^2
            fr = z4r + c2z2r + c0r
            fi = z4i + c2z2i + c0i
            acc = acc + (fr * fr + fi * fi) * gn

        if not mask_tail:
            out_ref[...] = fold_rows(acc).reshape(1, 1, SUB, w)
        else:
            # Only the last H tile can read past row `h`; pay the mask only
            # there.  The mask must stay immediately before the fold/store so
            # garbage rows never reach the reduction.
            is_last = pl.program_id(1) == pl.num_programs(1) - 1

            @pl.when(is_last)
            def _():
                row = jax.lax.broadcasted_iota(jnp.int32, (th, w), 0)
                masked = jnp.where(row < last_valid, acc, 0.0)
                out_ref[...] = fold_rows(masked).reshape(1, 1, SUB, w)

            @pl.when(jnp.logical_not(is_last))
            def _():
                out_ref[...] = fold_rows(acc).reshape(1, 1, SUB, w)

    return kernel


def _choose_tile_rows(n, h, w_pad, row_bytes):
    """Pick an H-tile (multiple of 8) from the VMEM budget / grid-step targets."""
    th = IN_BUDGET_BYTES // (2 * row_bytes)            # double-buffered inputs
    th = min(th, MAX_TILE_ELEMS // max(1, w_pad), _round_up(h, SUB))
    th = max(SUB, (th // SUB) * SUB)
    # Shrink (a little) if the grid would be too small to feed both TensorCores
    # / the pipeline, but never below MIN_TILE_ELEMS per step.
    while (n * _cdiv(h, th) < TARGET_GRID_STEPS
           and th > SUB
           and (th // 2) * w_pad >= MIN_TILE_ELEMS):
        th = max(SUB, ((th // 2) // SUB) * SUB)
    return th


def _crossfield_align_sum(targets, grads, gnorm, pre_channel):
    """Fused sum over channels & pixels of framefield_align_error * grad_norm.

    targets: [N, 4, H, W]      (c0_re, c0_im, c2_re, c2_im)
    grads  : [N, C, 2, H, W]   grads_normed
    gnorm  : [N, C, H, W]      grad_norm (already stop_gradient'ed)
    """
    n, _, h, w = targets.shape
    num_ch = len(pre_channel)
    w_pad = _round_up(w, LANE)

    # Bytes of one (all-plane) row in native dtypes, VMEM lane padding included.
    row_bytes = (4 * targets.dtype.itemsize
                 + num_ch * (2 * grads.dtype.itemsize + gnorm.dtype.itemsize)
                 ) * w_pad

    th = _choose_tile_rows(n, h, w_pad, row_bytes)
    n_h_tiles = _cdiv(h, th)
    mask_tail = (n_h_tiles * th) != h

    kernel = _make_kernel(num_ch, th, h, w, mask_tail)

    # Channel selection is static, baked into per-channel index_maps — no
    # gather, no transpose, no extra HBM pass before the kernel.
    c_spec = pl.BlockSpec((1, 4, th, w), lambda b, i: (b, 0, i, 0))
    z_specs = [
        pl.BlockSpec((1, 1, 2, th, w), lambda b, i, ch=ch: (b, ch, 0, i, 0))
        for ch in pre_channel
    ]
    gn_specs = [
        pl.BlockSpec((1, 1, th, w), lambda b, i, ch=ch: (b, ch, i, 0))
        for ch in pre_channel
    ]
    out_spec = pl.BlockSpec((1, 1, SUB, w), lambda b, i: (b, i, 0, 0))

    # Explicit scoped-VMEM limit from the computed double-buffered footprint.
    footprint = 2 * th * row_bytes + 2 * SUB * w_pad * 4
    vmem_limit = int(min(32 * 1024 * 1024,
                         max(16 * 1024 * 1024, footprint + 8 * 1024 * 1024)))

    partials = pl.pallas_call(
        kernel,
        out_shape=jax.ShapeDtypeStruct((n, n_h_tiles, SUB, w), jnp.float32),
        grid_spec=pltpu.PrefetchScalarGridSpec(
            num_scalar_prefetch=0,
            grid=(n, n_h_tiles),
            in_specs=[c_spec] + z_specs + gn_specs,
            out_specs=out_spec,
        ),
        compiler_params=pltpu.CompilerParams(
            dimension_semantics=("parallel", "parallel"),
            vmem_limit_bytes=vmem_limit),
    )(targets, *([grads] * num_ch), *([gnorm] * num_ch))

    return jnp.sum(partials)


class CrossfieldGradAlignLoss:
    """JAX/Pallas port of mmdet CrossfieldGradAlignLoss (forward only)."""

    def __init__(self, pre_channel, level_2_align=False):
        self.pre_channel = (
            pre_channel if isinstance(pre_channel, list) else [pre_channel])
        self.level_2_align = level_2_align

    def __call__(self, mask_grad, crossfield_targets, reduction='mean'):
        if self.level_2_align:
            # TODO(synk): framefield_align_error_2level has no public reference
            # semantics; only the standard framefield_align_error path is done.
            raise NotImplementedError("level_2_align=True not supported")
        if reduction not in ('mean', 'sum'):
            raise ValueError(f"unknown reduction {reduction}")

        targets = crossfield_targets                       # [N, 4, H, W]
        grads = mask_grad['grads_normed']                  # [N, C, 2, H, W]
        gnorm = jax.lax.stop_gradient(mask_grad['grad_norm'])  # .detach()

        if max(self.pre_channel) >= grads.shape[1]:
            raise ValueError("pre_channel index out of range")

        total = _crossfield_align_sum(targets, grads, gnorm,
                                      tuple(self.pre_channel))
        if reduction == 'mean':
            # Every channel averages over the same N*H*W pixels, so the fused
            # sum divided by N*H*W equals the sum of per-channel means.
            n, _, h, w = targets.shape
            return total / jnp.float32(n * h * w)
        return total


def _reference_loss(mask_grad, crossfield_targets, pre_channel, reduction='mean'):
    """Pure-jnp reference mirroring the PyTorch code."""
    c0 = crossfield_targets[:, :2]
    c2 = crossfield_targets[:, 2:]

    def cmul(a, b):  # complex mul along axis 1
        ar, ai = a[:, 0], a[:, 1]
        br, bi = b[:, 0], b[:, 1]
        return jnp.stack([ar * br - ai * bi, ar * bi + ai * br], axis=1)

    total = 0.0
    for ch in pre_channel:
        z = mask_grad['grads_normed'][:, ch]
        gn = mask_grad['grad_norm'][:, ch]
        z2 = cmul(z, z)
        z4 = cmul(z2, z2)
        f = z4 + cmul(c2, z2) + c0
        align = jnp.sum(jnp.square(f), axis=1)
        if reduction == 'mean':
            total = total + jnp.mean(align * gn)
        else:
            total = total + jnp.sum(align * gn)
    return total


def _run_case(key, n, c_pre, h, w, pre_channel):
    k1, k2, k3 = jax.random.split(key, 3)
    crossfield_targets = jax.random.normal(k1, (n, 4, h, w), dtype=jnp.float32)
    grads = jax.random.normal(k2, (n, c_pre, 2, h, w), dtype=jnp.float32)
    grads_normed = grads / (jnp.linalg.norm(grads, axis=2, keepdims=True) + 1e-6)
    grad_norm = jnp.abs(jax.random.normal(k3, (n, c_pre, h, w), dtype=jnp.float32))
    mask_grad = {'grads_normed': grads_normed, 'grad_norm': grad_norm}

    loss_mod = CrossfieldGradAlignLoss(pre_channel=pre_channel, level_2_align=False)

    out_mean = loss_mod(mask_grad, crossfield_targets, reduction='mean')
    out_sum = loss_mod(mask_grad, crossfield_targets, reduction='sum')
    jax.block_until_ready(out_mean)
    jax.block_until_ready(out_sum)

    ref_mean = _reference_loss(mask_grad, crossfield_targets, pre_channel, 'mean')
    ref_sum = _reference_loss(mask_grad, crossfield_targets, pre_channel, 'sum')

    assert jnp.allclose(out_mean, ref_mean, rtol=2e-5, atol=1e-4), (out_mean, ref_mean)
    assert jnp.allclose(out_sum, ref_sum, rtol=1e-4, atol=1e-2), (out_sum, ref_sum)


if __name__ == "__main__":
    key = jax.random.PRNGKey(0)
    k_small, k_big = jax.random.split(key)

    # Small case (matches the module's typical small-shape usage).
    _run_case(k_small, n=2, c_pre=4, h=16, w=16, pre_channel=[0, 2])

    # Larger case exercising multi-tile grid along H, the gated tail-row mask
    # (H=514 not divisible by the tile) and an unaligned lane width (W=131).
    _run_case(k_big, n=1, c_pre=3, h=514, w=131, pre_channel=[1, 2])

    print("KERNEL_OK")
</pallas_src>

<mosaic_0001>
module attributes {stable_mosaic.version = 11 : i64} {
  func.func @kernel(%arg0: i32, %arg1: i32, %arg2: memref<1x4x16x16xf32, #tpu.memory_space<vmem>>, %arg3: memref<1x1x2x16x16xf32, #tpu.memory_space<vmem>>, %arg4: memref<1x1x2x16x16xf32, #tpu.memory_space<vmem>>, %arg5: memref<1x1x16x16xf32, #tpu.memory_space<vmem>>, %arg6: memref<1x1x16x16xf32, #tpu.memory_space<vmem>>, %arg7: memref<1x1x8x16xf32, #tpu.memory_space<vmem>>) attributes {dimension_semantics = [#tpu.dimension_semantics<parallel>, #tpu.dimension_semantics<parallel>], iteration_bounds = array<i64: 2, 1>, scalar_prefetch = 0 : i64, scratch_operands = 0 : i64, tpu.core_type = #tpu.core_type<tc>, window_params = [{transform_indices = @transform_0, window_bounds = array<i64: 1, 4, 16, 16>}, {transform_indices = @transform_1, window_bounds = array<i64: 1, 1, 2, 16, 16>}, {transform_indices = @transform_2, window_bounds = array<i64: 1, 1, 2, 16, 16>}, {transform_indices = @transform_3, window_bounds = array<i64: 1, 1, 16, 16>}, {transform_indices = @transform_4, window_bounds = array<i64: 1, 1, 16, 16>}, {transform_indices = @transform_5, window_bounds = array<i64: 1, 1, 8, 16>}]} {
    %c0 = arith.constant 0 : index
    %c0_0 = arith.constant 0 : index
    %c0_1 = arith.constant 0 : index
    %c0_2 = arith.constant 0 : index
    %0 = vector.load %arg2[%c0, %c0_0, %c0_1, %c0_2] : memref<1x4x16x16xf32, #tpu.memory_space<vmem>>, vector<1x1x16x16xf32>
    %1 = vector.shape_cast %0 : vector<1x1x16x16xf32> to vector<16x16xf32>
    %c0_3 = arith.constant 0 : index
    %c1 = arith.constant 1 : index
    %c0_4 = arith.constant 0 : index
    %c0_5 = arith.constant 0 : index
    %2 = vector.load %arg2[%c0_3, %c1, %c0_4, %c0_5] : memref<1x4x16x16xf32, #tpu.memory_space<vmem>>, vector<1x1x16x16xf32>
    %3 = vector.shape_cast %2 : vector<1x1x16x16xf32> to vector<16x16xf32>
    %c0_6 = arith.constant 0 : index
    %c2 = arith.constant 2 : index
    %c0_7 = arith.constant 0 : index
    %c0_8 = arith.constant 0 : index
    %4 = vector.load %arg2[%c0_6, %c2, %c0_7, %c0_8] : memref<1x4x16x16xf32, #tpu.memory_space<vmem>>, vector<1x1x16x16xf32>
    %5 = vector.shape_cast %4 : vector<1x1x16x16xf32> to vector<16x16xf32>
    %c0_9 = arith.constant 0 : index
    %c3 = arith.constant 3 : index
    %c0_10 = arith.constant 0 : index
    %c0_11 = arith.constant 0 : index
    %6 = vector.load %arg2[%c0_9, %c3, %c0_10, %c0_11] : memref<1x4x16x16xf32, #tpu.memory_space<vmem>>, vector<1x1x16x16xf32>
    %7 = vector.shape_cast %6 : vector<1x1x16x16xf32> to vector<16x16xf32>
    %cst = arith.constant 0.000000e+00 : f32
    %8 = vector.broadcast %cst : f32 to vector<16x16xf32>
    %c0_12 = arith.constant 0 : index
    %c0_13 = arith.constant 0 : index
    %c0_14 = arith.constant 0 : index
    %c0_15 = arith.constant 0 : index
    %c0_16 = arith.constant 0 : index
    %9 = vector.load %arg3[%c0_12, %c0_13, %c0_14, %c0_15, %c0_16] : memref<1x1x2x16x16xf32, #tpu.memory_space<vmem>>, vector<1x1x1x16x16xf32>
    %10 = vector.shape_cast %9 : vector<1x1x1x16x16xf32> to vector<16x16xf32>
    %c0_17 = arith.constant 0 : index
    %c0_18 = arith.constant 0 : index
    %c1_19 = arith.constant 1 : index
    %c0_20 = arith.constant 0 : index
    %c0_21 = arith.constant 0 : index
    %11 = vector.load %arg3[%c0_17, %c0_18, %c1_19, %c0_20, %c0_21] : memref<1x1x2x16x16xf32, #tpu.memory_space<vmem>>, vector<1x1x1x16x16xf32>
    %12 = vector.shape_cast %11 : vector<1x1x1x16x16xf32> to vector<16x16xf32>
    %c0_22 = arith.constant 0 : index
    %c0_23 = arith.constant 0 : index
    %c0_24 = arith.constant 0 : index
    %c0_25 = arith.constant 0 : index
    %13 = vector.load %arg5[%c0_22, %c0_23, %c0_24, %c0_25] : memref<1x1x16x16xf32, #tpu.memory_space<vmem>>, vector<1x1x16x16xf32>
    %14 = vector.shape_cast %13 : vector<1x1x16x16xf32> to vector<16x16xf32>
    %15 = arith.mulf %10, %10 : vector<16x16xf32>
    %16 = arith.mulf %12, %12 : vector<16x16xf32>
    %17 = arith.subf %15, %16 : vector<16x16xf32>
    %cst_26 = arith.constant 2.000000e+00 : f32
    %18 = vector.broadcast %cst_26 : f32 to vector<16x16xf32>
    %19 = arith.mulf %18, %10 : vector<16x16xf32>
    %20 = arith.mulf %19, %12 : vector<16x16xf32>
    %21 = arith.mulf %17, %17 : vector<16x16xf32>
    %22 = arith.mulf %20, %20 : vector<16x16xf32>
    %23 = arith.subf %21, %22 : vector<16x16xf32>
    %cst_27 = arith.constant 2.000000e+00 : f32
    %24 = vector.broadcast %cst_27 : f32 to vector<16x16xf32>
    %25 = arith.mulf %24, %17 : vector<16x16xf32>
    %26 = arith.mulf %25, %20 : vector<16x16xf32>
    %27 = arith.mulf %5, %17 : vector<16x16xf32>
    %28 = arith.mulf %7, %20 : vector<16x16xf32>
    %29 = arith.subf %27, %28 : vector<16x16xf32>
    %30 = arith.mulf %5, %20 : vector<16x16xf32>
    %31 = arith.mulf %7, %17 : vector<16x16xf32>
    %32 = arith.addf %30, %31 : vector<16x16xf32>
    %33 = arith.addf %23, %29 : vector<16x16xf32>
    %34 = arith.addf %33, %1 : vector<16x16xf32>
    %35 = arith.addf %26, %32 : vector<16x16xf32>
    %36 = arith.addf %35, %3 : vector<16x16xf32>
    %37 = arith.mulf %34, %34 : vector<16x16xf32>
    %38 = arith.mulf %36, %36 : vector<16x16xf32>
    %39 = arith.addf %37, %38 : vector<16x16xf32>
    %40 = arith.mulf %39, %14 : vector<16x16xf32>
    %41 = arith.addf %8, %40 : vector<16x16xf32>
    %c0_28 = arith.constant 0 : index
    %c0_29 = arith.constant 0 : index
    %c0_30 = arith.constant 0 : index
    %c0_31 = arith.constant 0 : index
    %c0_32 = arith.constant 0 : index
    %42 = vector.load %arg4[%c0_28, %c0_29, %c0_30, %c0_31, %c0_32] : memref<1x1x2x16x16xf32, #tpu.memory_space<vmem>>, vector<1x1x1x16x16xf32>
    %43 = vector.shape_cast %42 : vector<1x1x1x16x16xf32> to vector<16x16xf32>
    %c0_33 = arith.constant 0 : index
    %c0_34 = arith.constant 0 : index
    %c1_35 = arith.constant 1 : index
    %c0_36 = arith.constant 0 : index
    %c0_37 = arith.constant 0 : index
    %44 = vector.load %arg4[%c0_33, %c0_34, %c1_35, %c0_36, %c0_37] : memref<1x1x2x16x16xf32, #tpu.memory_space<vmem>>, vector<1x1x1x16x16xf32>
    %45 = vector.shape_cast %44 : vector<1x1x1x16x16xf32> to vector<16x16xf32>
    %c0_38 = arith.constant 0 : index
    %c0_39 = arith.constant 0 : index
    %c0_40 = arith.constant 0 : index
    %c0_41 = arith.constant 0 : index
    %46 = vector.load %arg6[%c0_38, %c0_39, %c0_40, %c0_41] : memref<1x1x16x16xf32, #tpu.memory_space<vmem>>, vector<1x1x16x16xf32>
    %47 = vector.shape_cast %46 : vector<1x1x16x16xf32> to vector<16x16xf32>
    %48 = arith.mulf %43, %43 : vector<16x16xf32>
    %49 = arith.mulf %45, %45 : vector<16x16xf32>
    %50 = arith.subf %48, %49 : vector<16x16xf32>
    %cst_42 = arith.constant 2.000000e+00 : f32
    %51 = vector.broadcast %cst_42 : f32 to vector<16x16xf32>
    %52 = arith.mulf %51, %43 : vector<16x16xf32>
    %53 = arith.mulf %52, %45 : vector<16x16xf32>
    %54 = arith.mulf %50, %50 : vector<16x16xf32>
    %55 = arith.mulf %53, %53 : vector<16x16xf32>
    %56 = arith.subf %54, %55 : vector<16x16xf32>
    %cst_43 = arith.constant 2.000000e+00 : f32
    %57 = vector.broadcast %cst_43 : f32 to vector<16x16xf32>
    %58 = arith.mulf %57, %50 : vector<16x16xf32>
    %59 = arith.mulf %58, %53 : vector<16x16xf32>
    %60 = arith.mulf %5, %50 : vector<16x16xf32>
    %61 = arith.mulf %7, %53 : vector<16x16xf32>
    %62 = arith.subf %60, %61 : vector<16x16xf32>
    %63 = arith.mulf %5, %53 : vector<16x16xf32>
    %64 = arith.mulf %7, %50 : vector<16x16xf32>
    %65 = arith.addf %63, %64 : vector<16x16xf32>
    %66 = arith.addf %56, %62 : vector<16x16xf32>
    %67 = arith.addf %66, %1 : vector<16x16xf32>
    %68 = arith.addf %59, %65 : vector<16x16xf32>
    %69 = arith.addf %68, %3 : vector<16x16xf32>
    %70 = arith.mulf %67, %67 : vector<16x16xf32>
    %71 = arith.mulf %69, %69 : vector<16x16xf32>
    %72 = arith.addf %70, %71 : vector<16x16xf32>
    %73 = arith.mulf %72, %47 : vector<16x16xf32>
    %74 = arith.addf %41, %73 : vector<16x16xf32>
    %75 = vector.extract_strided_slice %74 {offsets = [0, 0], sizes = [8, 16], strides = [1, 1]} : vector<16x16xf32> to vector<8x16xf32>
    %76 = vector.extract_strided_slice %74 {offsets = [8, 0], sizes = [8, 16], strides = [1, 1]} : vector<16x16xf32> to vector<8x16xf32>
    %77 = arith.addf %75, %76 : vector<8x16xf32>
    %78 = vector.shape_cast %77 : vector<8x16xf32> to vector<1x1x8x16xf32>
    %c0_44 = arith.constant 0 : index
    %c0_45 = arith.constant 0 : index
    %c0_46 = arith.constant 0 : index
    %c0_47 = arith.constant 0 : index
    %79 = vector.load %arg7[%c0_44, %c0_45, %c0_46, %c0_47] : memref<1x1x8x16xf32, #tpu.memory_space<vmem>>, vector<1x1x8x16xf32>
    tpu.vector_store %arg7[%c0_44, %c0_45, %c0_46, %c0_47], %78 {strides = array<i32>} : memref<1x1x8x16xf32, #tpu.memory_space<vmem>>, vector<1x1x8x16xf32>,
    return
  }
  func.func @transform_0(%arg0: i32, %arg1: i32) -> (i32, i32, i32, i32) {
    %c0_i32 = arith.constant 0 : i32
    %c0_i32_0 = arith.constant 0 : i32
    %c0_i32_1 = arith.constant 0 : i32
    return %arg0, %c0_i32, %arg1, %c0_i32_0 : i32, i32, i32, i32
  }
  func.func @transform_1(%arg0: i32, %arg1: i32) -> (i32, i32, i32, i32, i32) {
    %c0_i32 = arith.constant 0 : i32
    %c0_i32_0 = arith.constant 0 : i32
    %c0_i32_1 = arith.constant 0 : i32
    %c0_i32_2 = arith.constant 0 : i32
    return %arg0, %c0_i32, %c0_i32_0, %arg1, %c0_i32_1 : i32, i32, i32, i32, i32
  }
  func.func @transform_2(%arg0: i32, %arg1: i32) -> (i32, i32, i32, i32, i32) {
    %c2_i32 = arith.constant 2 : i32
    %c0_i32 = arith.constant 0 : i32
    %c0_i32_0 = arith.constant 0 : i32
    %c0_i32_1 = arith.constant 0 : i32
    return %arg0, %c2_i32, %c0_i32, %arg1, %c0_i32_0 : i32, i32, i32, i32, i32
  }
  func.func @transform_3(%arg0: i32, %arg1: i32) -> (i32, i32, i32, i32) {
    %c0_i32 = arith.constant 0 : i32
    %c0_i32_0 = arith.constant 0 : i32
    %c0_i32_1 = arith.constant 0 : i32
    return %arg0, %c0_i32, %arg1, %c0_i32_0 : i32, i32, i32, i32
  }
  func.func @transform_4(%arg0: i32, %arg1: i32) -> (i32, i32, i32, i32) {
    %c2_i32 = arith.constant 2 : i32
    %c0_i32 = arith.constant 0 : i32
    %c0_i32_0 = arith.constant 0 : i32
    return %arg0, %c2_i32, %arg1, %c0_i32 : i32, i32, i32, i32
  }
  func.func @transform_5(%arg0: i32, %arg1: i32) -> (i32, i32, i32, i32) {
    %c0_i32 = arith.constant 0 : i32
    %c0_i32_0 = arith.constant 0 : i32
    %c0_i32_1 = arith.constant 0 : i32
    return %arg0, %arg1, %c0_i32, %c0_i32_0 : i32, i32, i32, i32
  }
}

</mosaic_0001>

<bundles_post_ra>
// kernel: tpu_custom_call.1
= control target key start
LH: loop header
LB: loop body
LE: loop exit
PB: predicated region body
PF: predicated region fallthrough
CT: control target
= control target key end

     0   :  { %s1456_s0 = inlined_call_operand.hbm [shape: f32[2,4,16,16], index: 0, kind: input, shape index: {}]   ;;  %s1457_s1 = inlined_call_operand.hbm [shape: f32[2,4,2,16,16], index: 1, kind: input, shape index: {}]   ;;  %s1458_s2 = inlined_call_operand.hbm [shape: f32[2,4,2,16,16], index: 2, kind: input, shape index: {}]   ;;  %s1459_s3 = inlined_call_operand.hbm [shape: f32[2,4,16,16], index: 3, kind: input, shape index: {}]   ;;  %s1460_s4 = inlined_call_operand.hbm [shape: f32[2,4,16,16], index: 4, kind: input, shape index: {}]   ;;  %s1461_s5 = inlined_call_operand.hbm [shape: f32[2,1,8,16], index: 5, kind: output, shape index: {}]  }
   0x1   :  { %1478 = sst [smem:[#allocation26_spill]] %s1457_s1 }
   0x2   :  { %1479 = sst [smem:[#allocation27_spill]] %s1458_s2 }
   0x3   :  { %1480 = sst [smem:[#allocation28_spill]] %s1459_s3 }
   0x4   :  { %1481 = sst [smem:[#allocation29_spill]] %s1461_s5 }
   0x5   :  { %10 = vsyncpa [#allocation3], 0 }
   0x6   :  { %12 = vsyncpa [#allocation3 + $0x1], 0 }
   0x7   :  { %13 = vsyncpa [#allocation6], 0 }
   0x8   :  { %15 = vsyncpa [#allocation6 + $0x1], 0 }
   0x9   :  { %16 = vsyncpa [#allocation9], 0 }
   0xa   :  { %18 = vsyncpa [#allocation9 + $0x1], 0 }
   0xb   :  { %19 = vsyncpa [#allocation4], 0 }
   0xc   :  { %21 = vsyncpa [#allocation4 + $0x1], 0  ;;  %s1162_s18 = smov 0   ;;  %s1164_s19 = smov 0  }
   0xd   :  { %s1166_s20 = smov 0   ;;  %s1168_s21 = smov 0  }
   0xe   :  { %s1170_s22 = smov 0   ;;  %s1172_s23 = smov 0  }
   0xf LB: > { %1482 = sst [smem:[#allocation16_spill]] %s1102_s18  ;;  %s1193_s24 = sadd.s32 4294967295, %s1122_s23   ;;  %s1122_s23 = sphi %s1172_s23, %s27_s23   ;;  %s1118_s22 = sphi %s1170_s22, %s1518_s22   ;;  %s1114_s21 = sphi %s1168_s21, %s1517_s21   ;;  %s1110_s20 = sphi %s1166_s20, %s1516_s20   ;;  %s1106_s19 = sphi %s1164_s19, %s1520_s19   ;;  %s1102_s18 = sphi %s1162_s18, %s1519_s18  }
  0x10   : > { %1483 = sst [smem:[#allocation17_spill]] %s1110_s20  ;;  %s764_s25 = sadd.s32 4294967294, %s1122_s23  }
  0x11   : > { %1484 = sst [smem:[#allocation18_spill]] %s1114_s21  ;;  %s39_s26 = sadd.s32 1, %s1118_s22 }
  0x12   : > { %1485 = sst [smem:[#allocation19_spill]] %s1118_s22  ;;  %s48_s27 = sadd.s32 1, %s1110_s20 }
  0x13   : > { %1486 = sst [smem:[#allocation20_spill]] %s1122_s23  ;;  %p41_p0 = scmp.ge.s32.totalorder %s39_s26, 2 }
  0x14   : > { %1487 = sst [smem:[#allocation21_spill]] %s1193_s24  ;;  %p55_p1 = scmp.ne.s32.totalorder %s1110_s20, %s1106_s19 }
  0x15   : > { %p56_p2 = scmp.eq.s32.totalorder %s1122_s23, 0  ;;  %p61_p3 = scmp.ne.s32.totalorder %s1106_s19, %s1102_s18 }
  0x16   : > { %s1522_s26 = smov (%p41_p0, %s39_s26), 0  ;;  %p62_p5 = scmp.eq.s32.totalorder %s1193_s24, 0 }
  0x17   : > { %1488 = sst [smem:[#allocation22_spill]] %s1522_s26  ;;  %p1205_p4 = por %p56_p2, %p55_p1 }
  0x18   : > { %s43_s29 = ssub.s32 %s1118_s22, %s1522_s26  ;;  %p199_p6 = scmp.eq.s32.totalorder %s1193_s24, 1 }
  0x19   : > { %p46_p7 = scmp.eq.s32.totalorder %s43_s29, 0  ;;  %p1213_p8 = por %p62_p5, %p61_p3 }
  0x1a   : > { %p1217_p9 = por %p199_p6, %p55_p1  ;;  %p205_p10 = scmp.eq.s32.totalorder %s764_s25, 1 }
  0x1b   : > { %s1222_s7 = scalar_select %p46_p7, %s1110_s20, %s48_s27  }
  0x1c   : > { %s1491_s6 = scalar_select %p1217_p9, 1, 0 }
  0x1d   : > { %1493 = sst [smem:[#allocation24_spill]] %s1222_s7  ;;  %p1224_p11 = por %p205_p10, %p61_p3 }
  0x1e   : > { %1492 = sst [smem:[#allocation23_spill]] %s1491_s6  ;;  %p840_p13 = scmp.lt.s32.totalorder %s1122_s23, 2 }
  0x1f   : > { %s1494_s8 = scalar_select %p1224_p11, 1, 0 }
  0x20   : > { %s1231_s9 = sand.u32 1, %s1110_s20   ;;  %p1235_p0 = pnand %p840_p13, %p1205_p4 }
  0x21   : > { %1495 = sst [smem:[#allocation25_spill]] %s1494_s8  ;;  %s1463_s11 = sand.u32 1, %s1122_s23  }
  0x22   : > { %s770_s12 = sshll.u32 %s1231_s9, 5  ;;  %s804_s13 = sshll.u32 %s1118_s22, 11 }
  0x23   : > { %s252_s14 = scalar_lea.vmem [#allocation5], %s770_s12  ;;  %s1497_s1 = sld [smem:[#allocation26_spill]] }
  0x24   : > { %s261_s15 = sshll.u32 %s252_s14, 4  ;;  %s1247_s27 = scalar_lea.sflag [#allocation6], %s1463_s11  ;;  %s262_s15 = int_to_ptr.vmem [resolvable:$true] %s261_s15 }
  0x25   : > { %p1251_p1 = pneg %p1235_p0  ;;  %s905_s29 = scalar_lea.vmem %s262_s15, 512 }
  0x26   : > { %p906_p2 = scmp.ne.s32.totalorder %s262_s15, %s905_s29  ;;  %s1124_s14 = smov [#allocation5]  }
  0x27   : > { %s910_s26 = sshll.u32 %s1124_s14, 4  ;;  %s911_s26 = int_to_ptr.vmem [resolvable:$false] %s910_s26 }
  0x28   : > { %p908_p3 = pnand %p906_p2, %p1251_p1  ;;  %s912_s16 = scalar_lea.vmem %s911_s26, 1024 }
  0x29   : > { %s260_s25 = scalar_lea.hbm %s1497_s1, %s804_s13  ;;  %p913_p5 = scmp.lt.s32.totalorder %s262_s15, %s911_s26 }
  0x2a   : > { %p909_p4 = pneg %p908_p3  ;;  %p914_p6 = scmp.lt.s32.totalorder %s912_s16, %s905_s29 }
  0x2c   : > { %p915_p7 = por %p914_p6, %p913_p5 }
  0x2e   : > { %p916_p10 = pnand %p915_p7, %p909_p4 }
  0x30   : > { %919 = shalt.err (!%p916_p10)
}
  0x31   : > { %s1466_s17 = smov 128   ;;  %s1468_s11 = smov 8  }
  0x32   : > { %826 = dma.hbm_to_vmem [thread:$0]  (!%p1235_p0), %s260_s25, 512, %s262_s15, %s1247_s27, %s1466_s17, %s1466_s17, %s1468_s11  }
  0x33   : > { %s1499_s2 = sld [smem:[#allocation27_spill]]  ;;  %s275_s1 = scalar_lea.vmem [#allocation7], %s770_s12 }
  0x34   : > { %s285_s7 = sshll.u32 %s275_s1, 4  ;;  %p782_p13 = scmp.ge.s32.totalorder %s1122_s23, 1  ;;  %s1269_s7 = int_to_ptr.vmem [resolvable:$true] %s285_s7 }
  0x35   : > { %p340_p2 = scmp.lt.s32.totalorder %s1122_s23, 3  ;;  %s1274_s20 = sshll.u32 %s1118_s22, 10 }
  0x36   : > { %s776_s8 = sshll.u32 %s1231_s9, 4  ;;  %s1501_s3 = sld [smem:[#allocation28_spill]] }
  0x37   : > { %p1277_p3 = pnand %p782_p13, %p340_p2  ;;  %s299_s26 = scalar_lea.vmem [#allocation8], %s776_s8 }
  0x38   : > { %s308_s16 = sshll.u32 %s299_s26, 4  ;;  %s1502_s1 = sand.u32 1, %s1122_s23   ;;  %s309_s16 = int_to_ptr.vmem [resolvable:$true] %s308_s16 }
  0x39   : > { %s1266_s29 = scalar_lea.hbm %s1499_s2, %s804_s13  ;;  %s1287_s12 = scalar_lea.sflag [#allocation9], %s1502_s1 }
  0x3a   : > { %s933_s17 = scalar_lea.vmem %s309_s16, 256  ;;  %s1127_s11 = smov [#allocation8]  }
  0x3b   : > { %p934_p4 = scmp.ne.s32.totalorder %s309_s16, %s933_s17  ;;  %s938_s2 = sshll.u32 %s1127_s11, 4  ;;  %s939_s2 = int_to_ptr.vmem [resolvable:$false] %s938_s2 }
  0x3c   : > { %s307_s14 = scalar_lea.hbm %s1501_s3, %s1274_s20  ;;  %s940_s22 = scalar_lea.vmem %s939_s2, 512 }
  0x3d   : > { %p936_p5 = pnand %p934_p4, %p1251_p1  ;;  %p941_p7 = scmp.lt.s32.totalorder %s309_s16, %s939_s2 }
  0x3e   : > { %p942_p10 = scmp.lt.s32.totalorder %s940_s22, %s933_s17 }
  0x3f   : > { %p937_p6 = pneg %p936_p5 }
  0x40   : > { %p943_p13 = por %p942_p10, %p941_p7 }
  0x42   : > { %p944_p2 = pnand %p943_p13, %p937_p6 }
  0x44   : > { %947 = shalt.err (!%p944_p2)
}
  0x45   : > { %s1503_s25 = smov 8   ;;  %s1504_s13 = smov 128  }
  0x46   : > { %832 = dma.hbm_to_vmem [thread:$0]  (!%p1235_p0), %s307_s14, 256, %s309_s16, %s1287_s12, %s1504_s13, %s1504_s13, %s1503_s25  }
  0x47   : > { %s322_s11 = scalar_lea.vmem [#allocation10], %s776_s8  ;;  %s767_s2 = sshll.u32 %s1231_s9, 6 }
  0x48   : > { %s332_s26 = sshll.u32 %s322_s11, 4  ;;  %s237_s1 = scalar_lea.hbm %s1456_s0, %s1274_s20  ;;  %s1297_s26 = int_to_ptr.vmem [resolvable:$true] %s332_s26 }
  0x49   : > { %s229_s3 = scalar_lea.vmem [#allocation2], %s767_s2  ;;  %s651_s6 = scalar_lea.hbm %s1460_s4, %s1274_s20 }
  0x4a   : > { %s238_s23 = sshll.u32 %s229_s3, 4  ;;  %s1308_s21 = scalar_lea.hbm %s651_s6, 512  ;;  %s239_s23 = int_to_ptr.vmem [resolvable:$true] %s238_s23 }
  0x4b   : > { %s226_s24 = scalar_lea.sflag [#allocation3], %s1231_s9  ;;  %s961_s16 = scalar_lea.vmem %s239_s23, 1024 }
  0x4c   : > { %p962_p4 = scmp.ne.s32.totalorder %s239_s23, %s961_s16  ;;  %s1128_s8 = smov [#allocation2]  }
  0x4d   : > { %s966_s14 = sshll.u32 %s1128_s8, 4  ;;  %s967_s14 = int_to_ptr.vmem [resolvable:$false] %s966_s14 }
  0x4e   : > { %p964_p5 = pnand %p962_p4, %p1251_p1  ;;  %s968_s11 = scalar_lea.vmem %s967_s14, 2048 }
  0x4f   : > { %p969_p7 = scmp.lt.s32.totalorder %s239_s23, %s967_s14  ;;  %p970_p10 = scmp.lt.s32.totalorder %s968_s11, %s961_s16 }
  0x50   : > { %p965_p6 = pneg %p964_p5 }
  0x51   : > { %p971_p13 = por %p970_p10, %p969_p7 }
  0x53   : > { %p972_p2 = pnand %p971_p13, %p965_p6 }
  0x55   : > { %975 = shalt.err (!%p972_p2)
}
  0x56   : > { %823 = dma.hbm_to_vmem [thread:$0]  (!%p1235_p0), %s237_s1, 1024, %s239_s23, %s226_s24, %s1504_s13, %s1504_s13, %s1503_s25  }
  0x57   : > { %s989_s3 = scalar_lea.vmem %s1269_s7, 512  ;;  %s1129_s5 = smov [#allocation7]  }
  0x58   : > { %p990_p4 = scmp.ne.s32.totalorder %s1269_s7, %s989_s3  ;;  %s994_s18 = sshll.u32 %s1129_s5, 4  ;;  %s995_s18 = int_to_ptr.vmem [resolvable:$false] %s994_s18 }
  0x59   : > { %s996_s20 = scalar_lea.vmem %s995_s18, 1024  ;;  %p997_p6 = scmp.lt.s32.totalorder %s1269_s7, %s995_s18 }
  0x5a   : > { %p992_p5 = pnand %p990_p4, %p1251_p1  ;;  %p998_p7 = scmp.lt.s32.totalorder %s996_s20, %s989_s3 }
  0x5c   : > { %p993_p12 = pneg %p992_p5  ;;  %p999_p10 = por %p998_p7, %p997_p6 }
  0x5e   : > { %p1000_p13 = pnand %p999_p10, %p993_p12 }
  0x60   : > { %1003 = shalt.err (!%p1000_p13)
}
  0x61   : > { %s1505_s23 = scalar_lea.hbm %s1266_s29, 1024  ;;  %s1018_s24 = scalar_lea.vmem %s1297_s26, 256 }
  0x62   : > { %829 = dma.hbm_to_vmem [thread:$0]  (!%p1235_p0), %s1505_s23, 512, %s1269_s7, %s1247_s27, %s1504_s13, %s1504_s13, %s1503_s25  }
  0x63   : > { %p1019_p2 = scmp.ne.s32.totalorder %s1297_s26, %s1018_s24  ;;  %s1130_s6 = smov [#allocation10]  }
  0x64   : > { %s1023_s9 = sshll.u32 %s1130_s6, 4  ;;  %s1024_s9 = int_to_ptr.vmem [resolvable:$false] %s1023_s9 }
  0x65   : > { %p1021_p4 = pnand %p1019_p2, %p1251_p1  ;;  %s1025_s2 = scalar_lea.vmem %s1024_s9, 512 }
  0x66   : > { %p1026_p5 = scmp.lt.s32.totalorder %s1297_s26, %s1024_s9  ;;  %p1027_p6 = scmp.lt.s32.totalorder %s1025_s2, %s1018_s24 }
  0x67   : > { %p1022_p12 = pneg %p1021_p4 }
  0x68   : > { %p1028_p7 = por %p1027_p6, %p1026_p5 }
  0x6a   : > { %p1029_p10 = pnand %p1028_p7, %p1022_p12 }
  0x6c   : > { %1032 = shalt.err (!%p1029_p10)
}
  0x6d   : > { %835 = dma.hbm_to_vmem [thread:$0]  (!%p1235_p0), %s1308_s21, 256, %s1297_s26, %s1287_s12, %s1504_s13, %s1504_s13, %s1503_s25  }
  0x6e   : > { %344 = sbr.rel (%p1277_p3) target bundleno = 177 (0xb1), region = 40  ;;  %s1348_s7 = sand.u32 (!%p1277_p3), 1, %s1106_s19  }
  0x6f   : > { %s783_s27 = sshll.u32 (!%p1277_p3), %s1348_s7, 6  ;;  %s347_s28 = scalar_lea.sflag (!%p1277_p3), [#allocation3], %s1348_s7 }
  0x70   : > { %s1352_s29 = scalar_lea.vmem (!%p1277_p3), [#allocation2], %s783_s27 }
  0x73   : > { %1085 = dma.done.wait (%p1213_p8), %s347_s28, 1024  }
  0x74   : > { %1087 = vsyncadd (%p1213_p8), %s347_s28, 4294966272  ;;  %s1506_s10 = sld [smem:[#allocation21_spill]]  ;;  %s784_s15 = sshll.u32 %s1348_s7, 5 }
  0x75   : > { %s359_s25 = scalar_lea.vmem [#allocation5], %s784_s15 }
  0x7a   : > { %s355_s21 = sand.u32 1, %s1506_s10  }
  0x7b   : > { %s356_s12 = scalar_lea.sflag [#allocation6], %s355_s21 }
  0x7c   : > { %1089 = dma.done.wait (%p1213_p8), %s356_s12, 1024  }
  0x7d   : > { %1091 = vsyncadd (%p1213_p8), %s356_s12, 4294966272  ;;  %s786_s13 = sshll.u32 %s1348_s7, 4  ;;  %s1365_s26 = scalar_lea.vmem [#allocation7], %s784_s15 }
  0x7e   : > { %s374_s22 = scalar_lea.sflag [#allocation9], %s355_s21  ;;  %s1369_s17 = scalar_lea.vmem [#allocation8], %s786_s13 }
  0x7f   : > { %1093 = dma.done.wait (%p1213_p8), %s374_s22, 512  }
  0x80   : > { %1095 = vsyncadd (%p1213_p8), %s374_s22, 4294966784  ;;  %v449_v0 = vld [vmem:[%s359_s25] sm:$0xff]  ;;  %v450_v1 = vld [vmem:[%s359_s25 + $0x8] sm:$0xff]  ;;  %s788_s30 = sshll.u32 %s1348_s7, 3  ;;  %s1507_s1 = sld [smem:[#allocation18_spill]]  ;;  %vm564_vm0 = vcmask 130048  }
  0x81   : > { %v795_v2 = vld [vmem:[%s359_s25 + $0x10] sm:$0xff]  ;;  %v796_v3 = vld [vmem:[%s359_s25 + $0x18] sm:$0xff]  ;;  %v456_v4 = vmul.f32 %v449_v0, %v449_v0  ;;  %v462_v5 = vmul.f32 2.0, %v449_v0  ;;  %v1376_v6 = vld [vmem:[%s1352_s29 + $0x20] sm:$0xff]  ;;  %v457_v8 = vmul.f32 %v450_v1, %v450_v1  ;;  %v463_v11 = vmul.f32 2.0, %v450_v1  ;;  %s386_s16 = scalar_lea.vmem [#allocation10], %s786_s13 }
  0x82   : > { %v1379_v7 = vld [vmem:[%s1352_s29 + $0x30] sm:$0xff]  ;;  %v458_v9 = vmul.f32 %v795_v2, %v795_v2  ;;  %v459_v10 = vmul.f32 %v796_v3, %v796_v3  ;;  %v506_v12 = vld [vmem:[%s1365_s26] sm:$0xff]  ;;  %v507_v14 = vld [vmem:[%s1365_s26 + $0x8] sm:$0xff]  ;;  %s432_s14 = scalar_lea.vmem [#allocation11], %s788_s30  ;;  %s1509_s20 = sld [smem:[#allocation29_spill]] }
  0x83   : > { %v464_v13 = vmul.f32 %v795_v2, %v462_v5  ;;  %v797_v15 = vld [vmem:[%s1365_s26 + $0x10] sm:$0xff]  ;;  %v513_v16 = vmul.f32 %v506_v12, %v506_v12  ;;  %v519_v17 = vmul.f32 2.0, %v506_v12  ;;  %v1385_v18 = vld [vmem:[%s1352_s29 + $0x28] sm:$0xff]  ;;  %v1388_v19 = vld [vmem:[%s1352_s29 + $0x38] sm:$0xff]  ;;  %v465_v22 = vmul.f32 %v796_v3, %v463_v11  ;;  %s581_s11 = sshll.u32 %s432_s14, 4  ;;  %s567_s6 = scalar_lea.sflag [#allocation4], %s1348_s7  ;;  %s582_s11 = int_to_ptr.vmem [resolvable:$true] %s581_s11 }
  0x84   : > { %v460_v20 = vsub.f32 %v456_v4, %v458_v9  ;;  %v461_v21 = vsub.f32 %v457_v8, %v459_v10  ;;  %v514_v23 = vmul.f32 %v507_v14, %v507_v14  ;;  %v515_v27 = vmul.f32 %v797_v15, %v797_v15  ;;  %v798_v36 = vld [vmem:[%s1365_s26 + $0x18] sm:$0xff]  ;;  %v438_v56 = vld [vmem:[%s1352_s29] sm:$0xff]  ;;  %v439_v57 = vld [vmem:[%s1352_s29 + $0x8] sm:$0xff]  ;;  %s1034_s9 = scalar_lea.vmem %s582_s11, 128  ;;  %s1131_s2 = smov [#allocation11]  }
  0x85   : > { %v468_v24 = vmul.f32 %v464_v13, %v464_v13  ;;  %v478_v25 = vmul.f32 %v1379_v7, %v464_v13  ;;  %v482_v26 = vmul.f32 %v1376_v6, %v464_v13  ;;  %v469_v30 = vmul.f32 %v465_v22, %v465_v22  ;;  %v789_v58 = vld [vmem:[%s1352_s29 + $0x10] sm:$0xff]  ;;  %v790_v1 = vld [vmem:[%s1352_s29 + $0x18] sm:$0xff]  ;;  %p1035_p8 = scmp.ne.s32.totalorder %s582_s11, %s1034_s9  ;;  %s1038_s27 = sshll.u32 %s1131_s2, 4  ;;  %s1039_s27 = int_to_ptr.vmem [resolvable:$false] %s1038_s27 }
  0x86   : > { %v466_v28 = vmul.f32 %v460_v20, %v460_v20  ;;  %v467_v29 = vmul.f32 %v461_v21, %v461_v21  ;;  %v472_v31 = vmul.f32 2.0, %v460_v20  ;;  %v473_v32 = vmul.f32 2.0, %v461_v21  ;;  %s800_s3 = sshll.u32 %s1507_s1, 7  ;;  %s1040_s28 = scalar_lea.vmem %s1039_s27, 256 }
  0x87   : > { %v476_v33 = vmul.f32 %v1376_v6, %v460_v20  ;;  %v477_v34 = vmul.f32 %v1385_v18, %v461_v21  ;;  %v479_v35 = vmul.f32 %v1388_v19, %v465_v22  ;;  %v483_v40 = vmul.f32 %v1385_v18, %v465_v22  ;;  %p1036_p0 = pnand %p1035_p8, %p1217_p9  ;;  %p1041_p3 = scmp.lt.s32.totalorder %s582_s11, %s1039_s27 }
  0x88   : > { %v470_v37 = vsub.f32 %v466_v28, %v468_v24  ;;  %v471_v38 = vsub.f32 %v467_v29, %v469_v30  ;;  %v474_v39 = vmul.f32 %v472_v31, %v464_v13  ;;  %v475_v41 = vmul.f32 %v473_v32, %v465_v22  ;;  %s1510_s24 = smov %s1509_s20  ;;  %s579_s23 = scalar_lea.hbm %s1509_s20, %s800_s3 }
  0x89   : > { %v480_v42 = vsub.f32 %v476_v33, %v478_v25  ;;  %v481_v43 = vsub.f32 %v477_v34, %v479_v35  ;;  %v484_v44 = vmul.f32 %v1379_v7, %v460_v20  ;;  %v485_v45 = vmul.f32 %v1388_v19, %v461_v21  ;;  %p1037_p1 = pneg %p1036_p0  ;;  %p1042_p13 = scmp.lt.s32.totalorder %s1040_s28, %s1034_s9 }
  0x8a   : > { %v516_v46 = vmul.f32 %v798_v36, %v798_v36  ;;  %v517_v47 = vsub.f32 %v513_v16, %v515_v27  ;;  %v520_v48 = vmul.f32 2.0, %v507_v14  ;;  %v521_v51 = vmul.f32 %v797_v15, %v519_v17 }
  0x8b   : > { %v486_v49 = vadd.f32 %v484_v44, %v482_v26  ;;  %v488_v50 = vadd.f32 %v480_v42, %v470_v37  ;;  %v487_v52 = vadd.f32 %v485_v45, %v483_v40  ;;  %v489_v53 = vadd.f32 %v481_v43, %v471_v38  ;;  %v511_v43 = vld [vmem:[%s386_s16] sm:$0xff]  ;;  %p1043_p2 = por %p1042_p13, %p1041_p3 }
  0x8c   : > { %v518_v54 = vsub.f32 %v514_v23, %v516_v46  ;;  %v522_v55 = vmul.f32 %v798_v36, %v520_v48  ;;  %v523_v60 = vmul.f32 %v517_v47, %v517_v47  ;;  %v525_v61 = vmul.f32 %v521_v51, %v521_v51  ;;  %v512_v46 = vld [vmem:[%s386_s16 + $0x8] sm:$0xff] }
  0x8d   : > { %v492_v59 = vadd.f32 %v486_v49, %v474_v39  ;;  %v493_v62 = vadd.f32 %v487_v52, %v475_v41  ;;  %v529_v2 = vmul.f32 2.0, %v517_v47  ;;  %v490_v3 = vadd.f32 %v488_v50, %v438_v56  ;;  %v455_v41 = vld [vmem:[%s1369_s17 + $0x8] sm:$0xff]  ;;  %p1044_p4 = pnand %p1043_p2, %p1037_p1 }
  0x8e   : > { %v524_v63 = vmul.f32 %v518_v54, %v518_v54  ;;  %v526_v0 = vmul.f32 %v522_v55, %v522_v55  ;;  %v491_v4 = vadd.f32 %v489_v53, %v439_v57  ;;  %v530_v8 = vmul.f32 2.0, %v518_v54 }
  0x8f   : > { %v494_v5 = vadd.f32 %v789_v58, %v492_v59  ;;  %v527_v9 = vsub.f32 %v523_v60, %v525_v61  ;;  %v533_v10 = vmul.f32 %v1376_v6, %v517_v47  ;;  %v534_v11 = vmul.f32 %v1385_v18, %v518_v54 }
  0x90   : > { %v535_v12 = vmul.f32 %v1379_v7, %v521_v51  ;;  %v495_v13 = vadd.f32 %v790_v1, %v493_v62  ;;  %v528_v14 = vsub.f32 %v524_v63, %v526_v0  ;;  %v536_v15 = vmul.f32 %v1388_v19, %v522_v55 }
  0x91   : > { %v539_v16 = vmul.f32 %v1376_v6, %v521_v51  ;;  %v531_v17 = vmul.f32 %v529_v2, %v521_v51  ;;  %v540_v21 = vmul.f32 %v1385_v18, %v522_v55  ;;  %v541_v22 = vmul.f32 %v1379_v7, %v517_v47 }
  0x92   : > { %v537_v20 = vsub.f32 %v533_v10, %v535_v12  ;;  %v532_v23 = vmul.f32 %v530_v8, %v522_v55  ;;  %v538_v24 = vsub.f32 %v534_v11, %v536_v15  ;;  %v542_v25 = vmul.f32 %v1388_v19, %v518_v54  ;;  %v454_v19 = vld [vmem:[%s1369_s17] sm:$0xff] }
  0x93   : > { %v496_v26 = vmul.f32 %v490_v3, %v490_v3  ;;  %v498_v27 = vmul.f32 %v494_v5, %v494_v5  ;;  %v543_v28 = vadd.f32 %v541_v22, %v539_v16  ;;  %v497_v30 = vmul.f32 %v491_v4, %v491_v4 }
  0x94   : > { %v545_v29 = vadd.f32 %v537_v20, %v527_v9  ;;  %v499_v31 = vmul.f32 %v495_v13, %v495_v13  ;;  %v544_v6 = vadd.f32 %v542_v25, %v540_v21  ;;  %v546_v32 = vadd.f32 %v538_v24, %v528_v14 }
  0x95   : > { %v549_v18 = vadd.f32 %v543_v28, %v531_v17  ;;  %v500_v35 = vadd.f32 %v498_v27, %v496_v26 }
  0x96   : > { %v547_v33 = vadd.f32 %v545_v29, %v438_v56  ;;  %v548_v34 = vadd.f32 %v546_v32, %v439_v57  ;;  %v550_v7 = vadd.f32 %v544_v6, %v532_v23  ;;  %v501_v38 = vadd.f32 %v499_v31, %v497_v30 }
  0x97   : > { %v551_v36 = vadd.f32 %v789_v58, %v549_v18  ;;  %v502_v45 = vmul.f32 %v500_v35, %v454_v19 }
  0x98   : > { %v553_v37 = vmul.f32 %v547_v33, %v547_v33  ;;  %v552_v39 = vadd.f32 %v790_v1, %v550_v7  ;;  %v554_v40 = vmul.f32 %v548_v34, %v548_v34  ;;  %v503_v48 = vmul.f32 %v501_v38, %v455_v41 }
  0x99   : > { %v555_v42 = vmul.f32 %v551_v36, %v551_v36 }
  0x9a   : > { %v556_v44 = vmul.f32 %v552_v39, %v552_v39 }
  0x9b   : > { %v557_v47 = vadd.f32 %v555_v42, %v553_v37 }
  0x9c   : > { %v558_v49 = vadd.f32 %v556_v44, %v554_v40 }
  0x9d   : > { %v559_v50 = vmul.f32 %v557_v47, %v511_v43 }
  0x9e   : > { %v560_v51 = vmul.f32 %v558_v49, %v512_v46 }
  0x9f   : > { %v561_v52 = vadd.f32 %v559_v50, %v502_v45 }
  0xa0   : > { %v562_v53 = vadd.f32 %v560_v51, %v503_v48 }
  0xa2   : > { %v563_v54 = vadd.f32 %v562_v53, %v561_v52 }
  0xa4   : > { %565 = vst.msk [vmem:[%s432_s14] sm:$0xff] %vm564_vm0, %v563_v54 }
  0xa5   : > { %1047 = shalt.err (!%p1044_p4)
}
  0xa6   : > { %s1048_s29 = scalar_lea.hbm %s579_s23, 128  ;;  %s1052_s21 = scalar_lea.hbm %s1510_s24, 256 }
  0xa7   : > { %p1049_p12 = scmp.ne.s32.totalorder %s579_s23, %s1048_s29  ;;  %p1053_p7 = scmp.lt.s32.totalorder %s579_s23, %s1510_s24 }
  0xa8   : > { %p1054_p10 = scmp.lt.s32.totalorder %s1052_s21, %s1048_s29 }
  0xa9   : > { %p1050_p5 = pnand %p1049_p12, %p1217_p9 }
  0xaa   : > { %p1055_p8 = por %p1054_p10, %p1053_p7 }
  0xab   : > { %p1051_p6 = pneg %p1050_p5 }
  0xad   : > { %p1056_p0 = pnand %p1055_p8, %p1051_p6 }
  0xaf   : > { %1059 = shalt.err (!%p1056_p0)
}
  0xb0   : > { %818 = dma.vmem_to_hbm [thread:$0]  (%p1217_p9), %s582_s11, 128, %s579_s23, %s567_s6  }
  0xb1 PF: > { %s1511_s25 = sld [smem:[#allocation16_spill]] }
  0xb2   : > { %s1513_s26 = sld [smem:[#allocation20_spill]] }
  0xb7   : > { %s593_s22 = sand.u32 1, %s1511_s25  }
  0xb8   : > { %p1514_p1 = scmp.ge.s32.totalorder %s1513_s26, 2  ;;  %s594_s17 = scalar_lea.sflag [#allocation4], %s593_s22 }
  0xba   : > { %p837_p3 = pnand %p1514_p1, %p1224_p11 }
  0xbc   : > { %p838_p13 = pneg %p837_p3 }
  0xbe   : > { %1097 = dma.done.wait (%p838_p13), %s594_s17, 128  }
  0xbf   : > { %1099 = vsyncadd (%p838_p13), %s594_s17, 4294967168  ;;  %s27_s23 = sadd.s32 1, %s1513_s26   ;;  %s1515_s30 = sld [smem:[#allocation17_spill]] }
  0xc0   : > { %p24_p2 = scmp.ge.s32.totalorder %s27_s23, 4   ;;  %s1516_s20 = sld [smem:[#allocation24_spill]] }
  0xc1   : > { %s1517_s21 = sld [smem:[#allocation19_spill]]  ;;  %s1519_s18 = smov %s1106_s19 }
  0xc2   : > { %s1518_s22 = sld [smem:[#allocation22_spill]]  ;;  %26 = sbr.rel (!%p24_p2) target bundleno = 15 (0xf), region = 138 }
  0xc5   : > { %s1520_s19 = smov %s1515_s30 }
  0xc7   :  { %599 = vsyncpa [#allocation3], 1 }
  0xc8   :  { %601 = vsyncpa [#allocation3 + $0x1], 1 }
  0xc9   :  { %602 = vsyncpa [#allocation6], 1 }
  0xca   :  { %604 = vsyncpa [#allocation6 + $0x1], 1 }
  0xcb   :  { %605 = vsyncpa [#allocation9], 1 }
  0xcc   :  { %607 = vsyncpa [#allocation9 + $0x1], 1 }
  0xcd   :  { %608 = vsyncpa [#allocation4], 1 }
  0xce   :  { %610 = vsyncpa [#allocation4 + $0x1], 1 }

</bundles_post_ra>
